<compile_context>
chip_gen: v6e
topology: v6e:2x2x1
jax: 0.10.0
libtpu: 0.0.40
codegen_flags: <defaults>
</compile_context>

<pallas_src>
import jax
import jax.numpy as jnp
from jax import lax
from jax.experimental import pallas as pl
from jax.experimental.pallas import tpu as pltpu


def linear_relu_kernel(x_ref, w_ref, b_ref, o_ref):
    # x: (B, in_features), w: (in_features, hidden) — pre-transposed once at
    # init time. Plain x @ w contraction, f32 accumulation on the MXU.
    h = lax.dot_general(
        x_ref[...], w_ref[...],
        dimension_numbers=(((1,), (0,)), ((), ())),
        preferred_element_type=jnp.float32,
    )
    # (B, H) + (1, H) broadcast bias add, then ReLU on the VPU.
    o_ref[...] = jnp.maximum(h + b_ref[...], 0.0).astype(o_ref.dtype)


@jax.jit
def neural_net_forward(x, w1_t, b1):
    """out = relu(x @ w1_t + b1), matching nn.Linear + nn.ReLU semantics.

    x   : (B, input_size) float32
    w1_t: (input_size, hidden) float32  (nn.Linear weight, transposed ONCE)
    b1  : (hidden,) float32
    """
    B = x.shape[0]
    H = w1_t.shape[1]
    b1_2d = b1.reshape(1, H)  # metadata-only under jit

    return pl.pallas_call(
        linear_relu_kernel,
        out_shape=jax.ShapeDtypeStruct((B, H), jnp.float32),
        in_specs=[
            pl.BlockSpec(memory_space=pltpu.MemorySpace.VMEM),
            pl.BlockSpec(memory_space=pltpu.MemorySpace.VMEM),
            pl.BlockSpec(memory_space=pltpu.MemorySpace.VMEM),
        ],
        out_specs=pl.BlockSpec(memory_space=pltpu.MemorySpace.VMEM),
    )(x, w1_t, b1_2d)


def init_params(key, input_size, hidden_size=128, output_size=4):
    """Deterministic PyTorch-style init: U(-1/sqrt(fan_in), 1/sqrt(fan_in)).

    Returns layer1's weight already transposed to (input_size, hidden) so the
    per-call path never pays a transpose or a lane-padded weight layout.
    """
    k1, k2, k3, k4 = jax.random.split(key, 4)
    bound1 = 1.0 / (input_size ** 0.5)
    bound2 = 1.0 / (hidden_size ** 0.5)
    w1 = jax.random.uniform(k1, (hidden_size, input_size), jnp.float32,
                            -bound1, bound1)
    b1 = jax.random.uniform(k2, (hidden_size,), jnp.float32, -bound1, bound1)
    # layer2 params exist in the module but are unused by forward().
    w2 = jax.random.uniform(k3, (output_size, hidden_size), jnp.float32,
                            -bound2, bound2)
    b2 = jax.random.uniform(k4, (output_size,), jnp.float32, -bound2, bound2)
    w1_t = jnp.asarray(w1.T)  # one-time transpose: (input_size, hidden)
    return w1, w1_t, b1, w2, b2


if __name__ == "__main__":
    # Lunar-lander observation size is 8. Batch 128 observations per call to
    # amortize dispatch and fill MXU rows (B multiple of 8, H multiple of 128).
    batch, input_size, hidden_size, output_size = 128, 8, 128, 4

    key = jax.random.PRNGKey(0)
    kx, kp = jax.random.split(key)
    x = jax.random.normal(kx, (batch, input_size), jnp.float32)
    w1, w1_t, b1, w2, b2 = init_params(kp, input_size, hidden_size, output_size)

    out = neural_net_forward(x, w1_t, b1)
    out = jax.block_until_ready(out)

    # sanity check against plain-JAX reference (PyTorch layout: x @ w1.T + b1)
    ref = jnp.maximum(x @ w1.T + b1, 0.0)
    assert out.shape == (batch, hidden_size)
    assert jnp.allclose(out, ref, atol=1e-5), "mismatch vs reference"

    print("KERNEL_OK")
</pallas_src>

<mosaic_0001>
module attributes {stable_mosaic.version = 11 : i64} {
  func.func @linear_relu_kernel(%arg0: memref<128x8xf32, #tpu.memory_space<vmem>>, %arg1: memref<8x128xf32, #tpu.memory_space<vmem>>, %arg2: memref<1x128xf32, #tpu.memory_space<vmem>>, %arg3: memref<128x128xf32, #tpu.memory_space<vmem>>) attributes {dimension_semantics = [], scalar_prefetch = 0 : i64, scratch_operands = 0 : i64, tpu.core_type = #tpu.core_type<tc>} {
    %c0 = arith.constant 0 : index
    %c0_0 = arith.constant 0 : index
    %0 = vector.load %arg0[%c0, %c0_0] : memref<128x8xf32, #tpu.memory_space<vmem>>, vector<128x8xf32>
    %c0_1 = arith.constant 0 : index
    %c0_2 = arith.constant 0 : index
    %1 = vector.load %arg1[%c0_1, %c0_2] : memref<8x128xf32, #tpu.memory_space<vmem>>, vector<8x128xf32>
    %cst = arith.constant dense<0.000000e+00> : vector<128x128xf32>
    %2 = tpu.matmul %0, %1, %cst {dimension_numbers = #tpu.dot_dimension_numbers<[1], [0], [0], [1], [0, 0, 1, 1], [], []>} : vector<128x8xf32>, vector<8x128xf32>, vector<128x128xf32> -> vector<128x128xf32>
    %c0_3 = arith.constant 0 : index
    %c0_4 = arith.constant 0 : index
    %3 = vector.load %arg2[%c0_3, %c0_4] : memref<1x128xf32, #tpu.memory_space<vmem>>, vector<1x128xf32>
    %4 = vector.broadcast %3 : vector<1x128xf32> to vector<128x128xf32>
    %5 = arith.addf %2, %4 : vector<128x128xf32>
    %cst_5 = arith.constant 0.000000e+00 : f32
    %6 = vector.broadcast %cst_5 : f32 to vector<128x128xf32>
    %7 = arith.maximumf %5, %6 : vector<128x128xf32>
    %c0_6 = arith.constant 0 : index
    %c0_7 = arith.constant 0 : index
    %8 = vector.load %arg3[%c0_6, %c0_7] : memref<128x128xf32, #tpu.memory_space<vmem>>, vector<128x128xf32>
    tpu.vector_store %arg3[%c0_6, %c0_7], %7 {strides = array<i32>} : memref<128x128xf32, #tpu.memory_space<vmem>>, vector<128x128xf32>,
    return
  }
}

</mosaic_0001>

<bundles_post_ra>
// kernel: neural_net_forward.1
= control target key start
LH: loop header
LB: loop body
LE: loop exit
PB: predicated region body
PF: predicated region fallthrough
CT: control target
= control target key end

     0   :  { %vm39_vm0 = vcmask 64512   ;;  %s464_s0 = inlined_call_operand.vmem [shape: f32[128,8], index: 0, kind: input, shape index: {}]   ;;  %s465_s1 = inlined_call_operand.vmem [shape: f32[8,128], index: 1, kind: input, shape index: {}]   ;;  %s466_s2 = inlined_call_operand.vmem [shape: f32[1,128], index: 2, kind: input, shape index: {}]   ;;  %s467_s3 = inlined_call_operand.hbm [shape: f32[128,128], index: 3, kind: output, shape index: {}]  }
   0x1   :  { %v31_v0 = vld [vmem:[%s465_s1] sm:$0xff]  ;;  %v16_v3 = vld [vmem:[%s464_s0 + $0x8] sm:$0xff]  ;;  %v17_v5 = vld [vmem:[%s464_s0 + $0x10] sm:$0xff] }
   0x2   :  { %v15_v1 = vld [vmem:[%s464_s0] sm:$0xff]  ;;  %315 = vmatprep.subr.mxu0 %v31_v0  ;;  %341 = vmatprep.subr.mxu1 %v31_v0  ;;  %v24_v4 = vld [vmem:[%s464_s0 + $0x48] sm:$0xff]  ;;  %v25_v6 = vld [vmem:[%s464_s0 + $0x50] sm:$0xff] }
   0x3   :  { %v23_v2 = vld [vmem:[%s464_s0 + $0x40] sm:$0xff]  ;;  %316 = vmatpush3.msra.mxu0 %v31_v0  ;;  %342 = vmatpush3.msra.mxu1 %v31_v0  ;;  %v18_v7 = vld [vmem:[%s464_s0 + $0x18] sm:$0xff] }
   0x4   :  { %317 = vmatprep.mubr.msk.f32.mxu0 %vm39_vm0, %v15_v1  ;;  %329 = vmatprep.mubr.msk.f32.mxu1 %vm39_vm0, %v23_v2  ;;  %v26_v8 = vld [vmem:[%s464_s0 + $0x58] sm:$0xff] }
   0x5   :  { %318 = vmatmul.mubr.msk.f32.vlgmr.msra.gmra.mxu0 %vm39_vm0, %v16_v3  ;;  %330 = vmatmul.mubr.msk.f32.vlgmr.msra.gmra.mxu1 %vm39_vm0, %v24_v4 }
   0x6   :  { %320 = vmatprep.mubr.msk.f32.mxu0 %vm39_vm0, %v17_v5  ;;  %332 = vmatprep.mubr.msk.f32.mxu1 %vm39_vm0, %v25_v6 }
   0x7   :  { %8 = vsyncpa [#allocation3], 0  ;;  %v19_v9 = vld [vmem:[%s464_s0 + $0x20] sm:$0xff]  ;;  %v20_v11 = vld [vmem:[%s464_s0 + $0x28] sm:$0xff] }
   0x8   :  { %v27_v10 = vld [vmem:[%s464_s0 + $0x60] sm:$0xff]  ;;  %v28_v12 = vld [vmem:[%s464_s0 + $0x68] sm:$0xff]  ;;  %v21_v13 = vld [vmem:[%s464_s0 + $0x30] sm:$0xff] }
   0x9   :  { %321 = vmatmul.mubr.msk.f32.gmra.mxu0 %vm39_vm0, %v18_v7  ;;  %333 = vmatmul.mubr.msk.f32.gmra.mxu1 %vm39_vm0, %v26_v8  ;;  %v29_v14 = vld [vmem:[%s464_s0 + $0x70] sm:$0xff]  ;;  %v22_v15 = vld [vmem:[%s464_s0 + $0x38] sm:$0xff]  ;;  %v281_v17 = vld [vmem:[%s466_s2] ss:$0 sm:$0xff] }
   0xa   :  { %323 = vmatprep.mubr.msk.f32.mxu0 %vm39_vm0, %v19_v9  ;;  %335 = vmatprep.mubr.msk.f32.mxu1 %vm39_vm0, %v27_v10  ;;  %v30_v16 = vld [vmem:[%s464_s0 + $0x78] sm:$0xff]  ;;  %s368_s0 = smov [#allocation2]  }
   0xb   :  { %s270_s2 = sshll.u32 %s368_s0, 4  ;;  %s271_s2 = int_to_ptr.vmem [resolvable:$true] %s270_s2 }
   0xc   :  { %s346_s20 = scalar_lea.vmem %s271_s2, 2048  ;;  %p351_p1 = scmp.lt.s32.totalorder %s271_s2, %s271_s2 }
   0xd   :  { %324 = vmatmul.mubr.msk.f32.gmra.mxu0 %vm39_vm0, %v20_v11  ;;  %336 = vmatmul.mubr.msk.f32.gmra.mxu1 %vm39_vm0, %v28_v12  ;;  %p347_p0 = scmp.ne.s32.totalorder %s271_s2, %s346_s20  ;;  %p352_p2 = scmp.lt.s32.totalorder %s346_s20, %s346_s20 }
   0xe   :  { %326 = vmatprep.mubr.msk.f32.mxu0 %vm39_vm0, %v21_v13  ;;  %338 = vmatprep.mubr.msk.f32.mxu1 %vm39_vm0, %v29_v14 }
   0xf   :  { %p353_p3 = por %p352_p2, %p351_p1 }
  0x11   :  { %327 = vmatmul.mubr.msk.f32.gmra.mxu0 %vm39_vm0, %v22_v15  ;;  %339 = vmatmul.mubr.msk.f32.gmra.mxu1 %vm39_vm0, %v30_v16  ;;  %p354_p4 = pnand %p353_p3, %p347_p0 }
  0xc5   :  { %v319_v18 = vpop.f32.mrf.mxu0  ;;  %v331_v19 = vpop.f32.mrf.mxu1 }
  0xc6   :  { %v160_v20 = vadd.f32 %v319_v18, %v281_v17  ;;  %v200_v21 = vadd.f32 %v331_v19, %v281_v17 }
  0xc7   :  { %v154_v22 = vpop.f32.mrf.mxu0  ;;  %v194_v23 = vpop.f32.mrf.mxu1 }
  0xc8   :  { %v234_v24 = vmax.f32 %v160_v20, 0.0  ;;  %v242_v25 = vmax.f32 %v200_v21, 0.0  ;;  %v155_v26 = vadd.f32 %v281_v17, %v154_v22  ;;  %v195_v27 = vadd.f32 %v281_v17, %v194_v23 }
  0xc9   :  { %v322_v28 = vpop.f32.mrf.mxu0  ;;  %v334_v29 = vpop.f32.mrf.mxu1 }
  0xca   :  { %250 = vst [vmem:[#allocation2 + $0x8] sm:$0xff] %v234_v24  ;;  %258 = vst [vmem:[#allocation2 + $0x48] sm:$0xff] %v242_v25  ;;  %v233_v30 = vmax.f32 %v155_v26, 0.0  ;;  %v241_v31 = vmax.f32 %v195_v27, 0.0  ;;  %v170_v32 = vadd.f32 %v322_v28, %v281_v17  ;;  %v210_v33 = vadd.f32 %v334_v29, %v281_v17 }
  0xcb   :  { %v164_v34 = vpop.f32.mrf.mxu0  ;;  %v204_v35 = vpop.f32.mrf.mxu1 }
  0xcc   :  { %249 = vst [vmem:[#allocation2] sm:$0xff] %v233_v30  ;;  %257 = vst [vmem:[#allocation2 + $0x40] sm:$0xff] %v241_v31  ;;  %v236_v36 = vmax.f32 %v170_v32, 0.0  ;;  %v244_v37 = vmax.f32 %v210_v33, 0.0  ;;  %v165_v38 = vadd.f32 %v281_v17, %v164_v34  ;;  %v205_v39 = vadd.f32 %v281_v17, %v204_v35 }
  0xcd   :  { %v325_v40 = vpop.f32.mrf.mxu0  ;;  %v337_v41 = vpop.f32.mrf.mxu1 }
  0xce   :  { %252 = vst [vmem:[#allocation2 + $0x18] sm:$0xff] %v236_v36  ;;  %260 = vst [vmem:[#allocation2 + $0x58] sm:$0xff] %v244_v37  ;;  %v235_v42 = vmax.f32 %v165_v38, 0.0  ;;  %v243_v43 = vmax.f32 %v205_v39, 0.0  ;;  %v180_v44 = vadd.f32 %v325_v40, %v281_v17  ;;  %v220_v45 = vadd.f32 %v337_v41, %v281_v17 }
  0xcf   :  { %v174_v46 = vpop.f32.mrf.mxu0  ;;  %v214_v47 = vpop.f32.mrf.mxu1 }
  0xd0   :  { %251 = vst [vmem:[#allocation2 + $0x10] sm:$0xff] %v235_v42  ;;  %259 = vst [vmem:[#allocation2 + $0x50] sm:$0xff] %v243_v43  ;;  %v238_v48 = vmax.f32 %v180_v44, 0.0  ;;  %v246_v49 = vmax.f32 %v220_v45, 0.0  ;;  %v175_v50 = vadd.f32 %v281_v17, %v174_v46  ;;  %v215_v51 = vadd.f32 %v281_v17, %v214_v47 }
  0xd1   :  { %v328_v52 = vpop.f32.mrf.mxu0  ;;  %v340_v53 = vpop.f32.mrf.mxu1 }
  0xd2   :  { %254 = vst [vmem:[#allocation2 + $0x28] sm:$0xff] %v238_v48  ;;  %262 = vst [vmem:[#allocation2 + $0x68] sm:$0xff] %v246_v49  ;;  %v237_v54 = vmax.f32 %v175_v50, 0.0  ;;  %v245_v55 = vmax.f32 %v215_v51, 0.0  ;;  %v190_v56 = vadd.f32 %v328_v52, %v281_v17  ;;  %v230_v57 = vadd.f32 %v340_v53, %v281_v17 }
  0xd3   :  { %v184_v58 = vpop.f32.mrf.mxu0  ;;  %v224_v59 = vpop.f32.mrf.mxu1 }
  0xd4   :  { %253 = vst [vmem:[#allocation2 + $0x20] sm:$0xff] %v237_v54  ;;  %261 = vst [vmem:[#allocation2 + $0x60] sm:$0xff] %v245_v55  ;;  %v240_v60 = vmax.f32 %v190_v56, 0.0  ;;  %v248_v61 = vmax.f32 %v230_v57, 0.0  ;;  %v185_v62 = vadd.f32 %v281_v17, %v184_v58  ;;  %v225_v63 = vadd.f32 %v281_v17, %v224_v59 }
  0xd6   :  { %256 = vst [vmem:[#allocation2 + $0x38] sm:$0xff] %v240_v60  ;;  %264 = vst [vmem:[#allocation2 + $0x78] sm:$0xff] %v248_v61  ;;  %v239_v0 = vmax.f32 %v185_v62, 0.0  ;;  %v247_v1 = vmax.f32 %v225_v63, 0.0 }
  0xd8   :  { %255 = vst [vmem:[#allocation2 + $0x30] sm:$0xff] %v239_v0  ;;  %263 = vst [vmem:[#allocation2 + $0x70] sm:$0xff] %v247_v1 }
  0xd9   :  { %357 = shalt.err (!%p354_p4)
}
  0xda   :  { %s369_s21 = smov 128   ;;  %s370_s1 = smov 8  }
  0xdb   :  { %276 = dma.vmem_to_hbm [thread:$0]  %s271_s2, 2048, %s467_s3, [#allocation3], %s369_s21, %s369_s21, %s370_s1  }
  0xdc   :  { %366 = dma.done.wait [#allocation3], 2048  }
  0xdd   :  { %367 = vsyncadd [#allocation3], 4294965248 }
  0xde   :  { %280 = vsyncpa [#allocation3], 1 }

</bundles_post_ra>
